<compile_context>
chip_gen: v5e
topology: v5e:2x2
jax: 0.10.0
libtpu: 0.0.40
codegen_flags: <defaults>
</compile_context>

<pallas_src>
import functools
import math

import jax
import jax.numpy as jnp
from jax import lax
from jax.experimental import pallas as pl
from jax.experimental.pallas import tpu as pltpu


_TQ_CAP = 512    # query rows per tile (multiple of 8 sublanes, or full dim)
_TK_CAP = 1024   # kv rows per tile    (multiple of 128 lanes, or full dim)
_SUBLANE = 8
_LANE = 128
_MM_DTYPE = jnp.bfloat16   # MXU operand dtype for both matmuls


def _vmem_limit_bytes():
    """Generation-aware scoped-VMEM budget (~3/4 of physical, capped at 100 MiB)."""
    try:
        cap = int(pltpu.get_tpu_info().vmem_capacity_bytes)
    except Exception:
        cap = 64 * 1024 * 1024          # conservative (v7x-sized) fallback
    return min(100 * 1024 * 1024, (cap * 3) // 4)


_VMEM_LIMIT = _vmem_limit_bytes()


def _choose_tile(n, cap, multiple):
    """Largest tile <= cap that divides n and is a multiple of `multiple`.
    Falls back to the full dim (block dim == array dim is always legal)."""
    # TODO(synk): awkward (indivisible) large dims fall back to one full-size tile;
    # pad/ragged-tile if such shapes ever show up in practice.
    if n <= cap:
        return n
    t = (cap // multiple) * multiple
    while t >= multiple:
        if n % t == 0:
            return t
        t -= multiple
    return n


def _q_tile(Lq):
    cap = _TQ_CAP
    # Prefer >=2 q-blocks (v7x megacore shards the "parallel" q axis across its two
    # TensorCores) as long as each block keeps >=256 rows, so single-core chips don't
    # pay extra K/V re-streaming for tiny problems.
    if Lq >= 2 * 256:
        cap = min(cap, (Lq // 2) // _SUBLANE * _SUBLANE)
    return _choose_tile(Lq, cap, _SUBLANE)


def _online_softmax_step(s, v, msk, m_sc, l_sc, acc_sc):
    """One kv-tile online-softmax update.  s: [tq, tk] f32 scores."""
    m_prev = m_sc[...]
    m_new = jnp.maximum(m_prev, jnp.max(s, axis=-1, keepdims=True))
    alpha = jnp.exp(m_prev - m_new)
    p = jnp.exp(s - m_new)
    if msk is not None:
        p = p * msk                       # softmax denom cancels -> mask exp directly
    l_sc[...] = alpha * l_sc[...] + jnp.sum(p, axis=-1, keepdims=True)
    acc_sc[...] = alpha * acc_sc[...] + jnp.dot(
        p.astype(_MM_DTYPE), v, preferred_element_type=jnp.float32)
    m_sc[...] = m_new


def _init_accumulators(q_ref, q_sc, m_sc, l_sc, acc_sc, scale):
    # Q block index is constant along the kv axis: scale (at f32) + cast to the
    # matmul dtype exactly once per q-tile.
    q_sc[...] = (q_ref[...].astype(jnp.float32) * scale).astype(q_sc.dtype)
    m_sc[...] = jnp.full_like(m_sc, -jnp.inf)
    l_sc[...] = jnp.zeros_like(l_sc)
    acc_sc[...] = jnp.zeros_like(acc_sc)


def _attn_fwd_kernel(q_ref, k_ref, v_ref, o_ref, q_sc, m_sc, l_sc, acc_sc, *, scale):
    kv = pl.program_id(1)

    @pl.when(kv == 0)
    def _init():
        _init_accumulators(q_ref, q_sc, m_sc, l_sc, acc_sc, scale)

    # [tq, tk] = Q . K contracting the hidden dim of both operands (no K transpose).
    # bf16 x bf16 on the MXU, f32 accumulate.
    s = lax.dot_general(q_sc[...], k_ref[...], (((1,), (1,)), ((), ())),
                        preferred_element_type=jnp.float32)
    _online_softmax_step(s, v_ref[...], None, m_sc, l_sc, acc_sc)

    @pl.when(kv == pl.num_programs(1) - 1)
    def _finalize():
        # Exact normalization: runs once per q-tile, essentially free.
        o_ref[...] = (acc_sc[...] / l_sc[...]).astype(o_ref.dtype)


def _attn_fwd_mask_kernel(q_ref, k_ref, v_ref, msk_ref, o_ref,
                          q_sc, m_sc, l_sc, acc_sc, *, scale):
    kv = pl.program_id(1)

    @pl.when(kv == 0)
    def _init():
        _init_accumulators(q_ref, q_sc, m_sc, l_sc, acc_sc, scale)

    s = lax.dot_general(q_sc[...], k_ref[...], (((1,), (1,)), ((), ())),
                        preferred_element_type=jnp.float32)
    _online_softmax_step(s, v_ref[...], msk_ref[...].astype(jnp.float32),
                         m_sc, l_sc, acc_sc)

    @pl.when(kv == pl.num_programs(1) - 1)
    def _finalize():
        # NOTE: an all-zero mask row gives sum==0 -> inf/NaN, same hazard as the
        # PyTorch original; callers must supply masks with >=1 live key per row.
        o_ref[...] = (acc_sc[...] / l_sc[...]).astype(o_ref.dtype)


def _scratch(tq, h, dv):
    return [pltpu.VMEM((tq, h), _MM_DTYPE),        # scaled+cast Q (hoisted out of kv loop)
            pltpu.VMEM((tq, 1), jnp.float32),      # running max
            pltpu.VMEM((tq, 1), jnp.float32),      # running denom
            pltpu.VMEM((tq, dv), jnp.float32)]     # running output acc


def _compiler_params():
    return pltpu.CompilerParams(
        dimension_semantics=("parallel", "arbitrary"),
        vmem_limit_bytes=_VMEM_LIMIT)


def _prep_kv(key, value):
    # bf16 MXU operands; also halves K/V HBM traffic per kv step.
    if key.dtype != _MM_DTYPE:
        key = key.astype(_MM_DTYPE)
    if value.dtype != _MM_DTYPE:
        value = value.astype(_MM_DTYPE)
    return key, value


@jax.jit
def scaled_dot_attention(query, key, value):
    Lq, Hq = query.shape
    Lk, H = key.shape
    Lkv, Dv = value.shape
    assert Hq == H and Lkv == Lk
    scale = 1.0 / math.sqrt(H)
    key, value = _prep_kv(key, value)

    tq = _q_tile(Lq)
    tk = _choose_tile(Lk, _TK_CAP, _LANE)
    grid = (Lq // tq, Lk // tk)

    return pl.pallas_call(
        functools.partial(_attn_fwd_kernel, scale=scale),
        out_shape=jax.ShapeDtypeStruct((Lq, Dv), query.dtype),
        grid_spec=pltpu.PrefetchScalarGridSpec(
            num_scalar_prefetch=0,
            grid=grid,
            in_specs=[
                pl.BlockSpec((tq, H), lambda i, j: (i, 0)),
                pl.BlockSpec((tk, H), lambda i, j: (j, 0)),
                pl.BlockSpec((tk, Dv), lambda i, j: (j, 0)),
            ],
            out_specs=pl.BlockSpec((tq, Dv), lambda i, j: (i, 0)),
            scratch_shapes=_scratch(tq, H, Dv),
        ),
        compiler_params=_compiler_params(),
    )(query, key, value)


@jax.jit
def scaled_dot_attention_masked(query, key, value, mask):
    assert mask.ndim == 2 and mask.shape[0] == query.shape[0] \
        and mask.shape[1] == key.shape[1], "masking size mismatch in attention layer"
    Lq, H = query.shape
    Lk, _ = key.shape
    _, Dv = value.shape
    # Inherited PyTorch contract (mask cols == hidden size) => only consistent if Lk == H.
    assert mask.shape[1] == Lk, "masked path requires Lk == hidden_size (inherited contract)"
    scale = 1.0 / math.sqrt(H)
    key, value = _prep_kv(key, value)

    # Binary / integer masks streamed at 2 B/elem (exact for 0/1); float-valued masks
    # keep their dtype so arbitrary reweighting masks stay bit-faithful to the spec.
    if mask.dtype == jnp.bool_ or jnp.issubdtype(mask.dtype, jnp.integer):
        mask = mask.astype(_MM_DTYPE)

    tq = _q_tile(Lq)
    tk = _choose_tile(Lk, _TK_CAP, _LANE)   # 128-multiple (or full) so the mask tile is lane-legal
    grid = (Lq // tq, Lk // tk)

    return pl.pallas_call(
        functools.partial(_attn_fwd_mask_kernel, scale=scale),
        out_shape=jax.ShapeDtypeStruct((Lq, Dv), query.dtype),
        grid_spec=pltpu.PrefetchScalarGridSpec(
            num_scalar_prefetch=0,
            grid=grid,
            in_specs=[
                pl.BlockSpec((tq, H), lambda i, j: (i, 0)),
                pl.BlockSpec((tk, H), lambda i, j: (j, 0)),
                pl.BlockSpec((tk, Dv), lambda i, j: (j, 0)),
                pl.BlockSpec((tq, tk), lambda i, j: (i, j)),
            ],
            out_specs=pl.BlockSpec((tq, Dv), lambda i, j: (i, 0)),
            scratch_shapes=_scratch(tq, H, Dv),
        ),
        compiler_params=_compiler_params(),
    )(query, key, value, mask)


# ------------------------- pure-JAX references -------------------------

def _ref_unmasked(q, k, v):
    s = (q @ k.T) / jnp.sqrt(jnp.float32(k.shape[1]))
    return jax.nn.softmax(s, axis=-1) @ v


def _ref_masked(q, k, v, m):
    s = (q @ k.T) / jnp.sqrt(jnp.float32(k.shape[1]))
    e = jax.nn.softmax(s, axis=-1) * m
    return (e / jnp.sum(e, axis=-1, keepdims=True)) @ v


if __name__ == "__main__":
    keys = jax.random.split(jax.random.PRNGKey(0), 12)
    # Tolerance reflects bf16 MXU operands (documented tradeoff); finalize divide is exact.
    ATOL = RTOL = 2e-2

    # ---- unmasked, module-typical small shapes: Q [8,32], K [16,32], V [16,32] ----
    Lq, Lk, H, Dv = 8, 16, 32, 32
    Q = jax.random.normal(keys[0], (Lq, H), jnp.float32)
    K = jax.random.normal(keys[1], (Lk, H), jnp.float32)
    V = jax.random.normal(keys[2], (Lk, Dv), jnp.float32)
    out = jax.block_until_ready(scaled_dot_attention(Q, K, V))
    assert out.shape == (Lq, Dv)
    assert jnp.allclose(out, _ref_unmasked(Q, K, V), atol=ATOL, rtol=RTOL)

    # ---- unmasked, multi-tile grid (2 q-tiles x 2 kv-tiles, online softmax) ----
    Lq, Lk, H, Dv = 512, 2048, 128, 128
    Q = jax.random.normal(keys[3], (Lq, H), jnp.float32)
    K = jax.random.normal(keys[4], (Lk, H), jnp.float32)
    V = jax.random.normal(keys[5], (Lk, Dv), jnp.float32)
    out = jax.block_until_ready(scaled_dot_attention(Q, K, V))
    assert jnp.allclose(out, _ref_unmasked(Q, K, V), atol=ATOL, rtol=RTOL)

    # ---- masked, module-typical small shapes (Lk == H per inherited assert) ----
    Lq, Lk, H, Dv = 8, 16, 16, 32
    Q = jax.random.normal(keys[6], (Lq, H), jnp.float32)
    K = jax.random.normal(keys[7], (Lk, H), jnp.float32)
    V = jax.random.normal(keys[8], (Lk, Dv), jnp.float32)
    Mb = jax.random.uniform(keys[9], (Lq, Lk)) > 0.3
    Mb = Mb.at[:, 0].set(True)   # guarantee no all-zero row (div-by-zero hazard as in PyTorch)
    out_m = jax.block_until_ready(scaled_dot_attention_masked(Q, K, V, Mb))
    assert out_m.shape == (Lq, Dv)
    assert jnp.allclose(out_m, _ref_masked(Q, K, V, Mb.astype(jnp.float32)),
                        atol=ATOL, rtol=RTOL)

    # ---- masked, multi-kv-tile grid (Lk == H == 2048 -> 2 kv tiles of 1024) ----
    Lq, Lk, H, Dv = 256, 2048, 2048, 128
    Q = jax.random.normal(keys[10], (Lq, H), jnp.float32)
    K = jax.random.normal(keys[11], (Lk, H), jnp.float32)
    V = jax.random.normal(keys[5], (Lk, Dv), jnp.float32)
    Mb = jax.random.uniform(keys[9], (Lq, Lk)) > 0.3
    Mb = Mb.at[:, 0].set(True)
    out_m = jax.block_until_ready(scaled_dot_attention_masked(Q, K, V, Mb))
    assert jnp.allclose(out_m, _ref_masked(Q, K, V, Mb.astype(jnp.float32)),
                        atol=ATOL, rtol=RTOL)

    print("KERNEL_OK")
</pallas_src>

<mosaic_0001>
module attributes {stable_mosaic.version = 11 : i64} {
  func.func @_attn_fwd_kernel(%arg0: i32, %arg1: i32, %arg2: memref<8x32xf32, #tpu.memory_space<vmem>>, %arg3: memref<16x32xbf16, #tpu.memory_space<vmem>>, %arg4: memref<16x32xbf16, #tpu.memory_space<vmem>>, %arg5: memref<8x32xf32, #tpu.memory_space<vmem>>, %arg6: memref<8x32xbf16, #tpu.memory_space<vmem>>, %arg7: memref<8x1xf32, #tpu.memory_space<vmem>>, %arg8: memref<8x1xf32, #tpu.memory_space<vmem>>, %arg9: memref<8x32xf32, #tpu.memory_space<vmem>>) attributes {dimension_semantics = [#tpu.dimension_semantics<parallel>, #tpu.dimension_semantics<arbitrary>], iteration_bounds = array<i64: 1, 1>, scalar_prefetch = 0 : i64, scratch_operands = 4 : i64, tpu.core_type = #tpu.core_type<tc>, window_params = [{transform_indices = @transform_0, window_bounds = array<i64: 8, 32>}, {transform_indices = @transform_1, window_bounds = array<i64: 16, 32>}, {transform_indices = @transform_2, window_bounds = array<i64: 16, 32>}, {transform_indices = @transform_3, window_bounds = array<i64: 8, 32>}]} {
    %c0_i32 = arith.constant 0 : i32
    %0 = arith.cmpi eq, %arg1, %c0_i32 : i32
    %1 = arith.extui %0 : i1 to i32
    %c0_i32_0 = arith.constant 0 : i32
    %2 = arith.cmpi ne, %1, %c0_i32_0 : i32
    scf.if %2 {
      %c0_23 = arith.constant 0 : index
      %c0_24 = arith.constant 0 : index
      %33 = vector.load %arg2[%c0_23, %c0_24] : memref<8x32xf32, #tpu.memory_space<vmem>>, vector<8x32xf32>
      %cst_25 = arith.constant 0.176776692 : f32
      %34 = vector.broadcast %cst_25 : f32 to vector<8x32xf32>
      %35 = arith.mulf %33, %34 : vector<8x32xf32>
      %36 = arith.truncf %35 : vector<8x32xf32> to vector<8x32xbf16>
      %c0_26 = arith.constant 0 : index
      %c0_27 = arith.constant 0 : index
      %37 = vector.load %arg6[%c0_26, %c0_27] : memref<8x32xbf16, #tpu.memory_space<vmem>>, vector<8x32xbf16>
      tpu.vector_store %arg6[%c0_26, %c0_27], %36 {strides = array<i32>} : memref<8x32xbf16, #tpu.memory_space<vmem>>, vector<8x32xbf16>,
      %cst_28 = arith.constant 0xFF800000 : f32
      %38 = vector.broadcast %cst_28 : f32 to vector<8x1xf32>
      %c0_29 = arith.constant 0 : index
      %c0_30 = arith.constant 0 : index
      %39 = vector.load %arg7[%c0_29, %c0_30] : memref<8x1xf32, #tpu.memory_space<vmem>>, vector<8x1xf32>
      tpu.vector_store %arg7[%c0_29, %c0_30], %38 {strides = array<i32>} : memref<8x1xf32, #tpu.memory_space<vmem>>, vector<8x1xf32>,
      %cst_31 = arith.constant 0.000000e+00 : f32
      %40 = vector.broadcast %cst_31 : f32 to vector<8x1xf32>
      %c0_32 = arith.constant 0 : index
      %c0_33 = arith.constant 0 : index
      %41 = vector.load %arg8[%c0_32, %c0_33] : memref<8x1xf32, #tpu.memory_space<vmem>>, vector<8x1xf32>
      tpu.vector_store %arg8[%c0_32, %c0_33], %40 {strides = array<i32>} : memref<8x1xf32, #tpu.memory_space<vmem>>, vector<8x1xf32>,
      %cst_34 = arith.constant 0.000000e+00 : f32
      %42 = vector.broadcast %cst_34 : f32 to vector<8x32xf32>
      %c0_35 = arith.constant 0 : index
      %c0_36 = arith.constant 0 : index
      %43 = vector.load %arg9[%c0_35, %c0_36] : memref<8x32xf32, #tpu.memory_space<vmem>>, vector<8x32xf32>
      tpu.vector_store %arg9[%c0_35, %c0_36], %42 {strides = array<i32>} : memref<8x32xf32, #tpu.memory_space<vmem>>, vector<8x32xf32>,
    } else {
    }
    %c0 = arith.constant 0 : index
    %c0_1 = arith.constant 0 : index
    %3 = vector.load %arg6[%c0, %c0_1] : memref<8x32xbf16, #tpu.memory_space<vmem>>, vector<8x32xbf16>
    %c0_2 = arith.constant 0 : index
    %c0_3 = arith.constant 0 : index
    %4 = vector.load %arg3[%c0_2, %c0_3] : memref<16x32xbf16, #tpu.memory_space<vmem>>, vector<16x32xbf16>
    %cst = arith.constant dense<0.000000e+00> : vector<8x16xf32>
    %5 = tpu.matmul %3, %4, %cst {dimension_numbers = #tpu.dot_dimension_numbers<[1], [1], [0], [0], [0, 0, 1, 0], [], []>} : vector<8x32xbf16>, vector<16x32xbf16>, vector<8x16xf32> -> vector<8x16xf32>
    %c0_4 = arith.constant 0 : index
    %c0_5 = arith.constant 0 : index
    %6 = vector.load %arg4[%c0_4, %c0_5] : memref<16x32xbf16, #tpu.memory_space<vmem>>, vector<16x32xbf16>
    %c0_6 = arith.constant 0 : index
    %c0_7 = arith.constant 0 : index
    %7 = vector.load %arg7[%c0_6, %c0_7] : memref<8x1xf32, #tpu.memory_space<vmem>>, vector<8x1xf32>
    %cst_8 = arith.constant dense<0xFF800000> : vector<8xf32>
    %8 = vector.multi_reduction <maximumf>, %5, %cst_8 [1] : vector<8x16xf32> to vector<8xf32>
    %9 = vector.shape_cast %8 : vector<8xf32> to vector<8x1xf32>
    %10 = arith.maximumf %7, %9 : vector<8x1xf32>
    %11 = arith.subf %7, %10 : vector<8x1xf32>
    %12 = math.exp %11 : vector<8x1xf32>
    %13 = vector.broadcast %10 : vector<8x1xf32> to vector<8x16xf32>
    %14 = arith.subf %5, %13 : vector<8x16xf32>
    %15 = math.exp %14 : vector<8x16xf32>
    %c0_9 = arith.constant 0 : index
    %c0_10 = arith.constant 0 : index
    %16 = vector.load %arg8[%c0_9, %c0_10] : memref<8x1xf32, #tpu.memory_space<vmem>>, vector<8x1xf32>
    %17 = arith.mulf %12, %16 : vector<8x1xf32>
    %cst_11 = arith.constant dense<0.000000e+00> : vector<8xf32>
    %18 = vector.multi_reduction <add>, %15, %cst_11 [1] : vector<8x16xf32> to vector<8xf32>
    %19 = vector.shape_cast %18 : vector<8xf32> to vector<8x1xf32>
    %20 = arith.addf %17, %19 : vector<8x1xf32>
    %c0_12 = arith.constant 0 : index
    %c0_13 = arith.constant 0 : index
    %21 = vector.load %arg8[%c0_12, %c0_13] : memref<8x1xf32, #tpu.memory_space<vmem>>, vector<8x1xf32>
    tpu.vector_store %arg8[%c0_12, %c0_13], %20 {strides = array<i32>} : memref<8x1xf32, #tpu.memory_space<vmem>>, vector<8x1xf32>,
    %c0_14 = arith.constant 0 : index
    %c0_15 = arith.constant 0 : index
    %22 = vector.load %arg9[%c0_14, %c0_15] : memref<8x32xf32, #tpu.memory_space<vmem>>, vector<8x32xf32>
    %23 = vector.broadcast %12 : vector<8x1xf32> to vector<8x32xf32>
    %24 = arith.mulf %23, %22 : vector<8x32xf32>
    %25 = arith.truncf %15 : vector<8x16xf32> to vector<8x16xbf16>
    %cst_16 = arith.constant dense<0.000000e+00> : vector<8x32xf32>
    %26 = tpu.matmul %25, %6, %cst_16 {dimension_numbers = #tpu.dot_dimension_numbers<[1], [0], [0], [1], [0, 0, 1, 1], [], []>} : vector<8x16xbf16>, vector<16x32xbf16>, vector<8x32xf32> -> vector<8x32xf32>
    %27 = arith.addf %24, %26 : vector<8x32xf32>
    %c0_17 = arith.constant 0 : index
    %c0_18 = arith.constant 0 : index
    %28 = vector.load %arg9[%c0_17, %c0_18] : memref<8x32xf32, #tpu.memory_space<vmem>>, vector<8x32xf32>
    tpu.vector_store %arg9[%c0_17, %c0_18], %27 {strides = array<i32>} : memref<8x32xf32, #tpu.memory_space<vmem>>, vector<8x32xf32>,
    %c0_19 = arith.constant 0 : index
    %c0_20 = arith.constant 0 : index
    %29 = vector.load %arg7[%c0_19, %c0_20] : memref<8x1xf32, #tpu.memory_space<vmem>>, vector<8x1xf32>
    tpu.vector_store %arg7[%c0_19, %c0_20], %10 {strides = array<i32>} : memref<8x1xf32, #tpu.memory_space<vmem>>, vector<8x1xf32>,
    %c0_i32_21 = arith.constant 0 : i32
    %30 = arith.cmpi eq, %arg1, %c0_i32_21 : i32
    %31 = arith.extui %30 : i1 to i32
    %c0_i32_22 = arith.constant 0 : i32
    %32 = arith.cmpi ne, %31, %c0_i32_22 : i32
    scf.if %32 {
      %c0_23 = arith.constant 0 : index
      %c0_24 = arith.constant 0 : index
      %33 = vector.load %arg9[%c0_23, %c0_24] : memref<8x32xf32, #tpu.memory_space<vmem>>, vector<8x32xf32>
      %c0_25 = arith.constant 0 : index
      %c0_26 = arith.constant 0 : index
      %34 = vector.load %arg8[%c0_25, %c0_26] : memref<8x1xf32, #tpu.memory_space<vmem>>, vector<8x1xf32>
      %35 = vector.broadcast %34 : vector<8x1xf32> to vector<8x32xf32>
      %36 = arith.divf %33, %35 : vector<8x32xf32>
      %c0_27 = arith.constant 0 : index
      %c0_28 = arith.constant 0 : index
      %37 = vector.load %arg5[%c0_27, %c0_28] : memref<8x32xf32, #tpu.memory_space<vmem>>, vector<8x32xf32>
      tpu.vector_store %arg5[%c0_27, %c0_28], %36 {strides = array<i32>} : memref<8x32xf32, #tpu.memory_space<vmem>>, vector<8x32xf32>,
    } else {
    }
    return
  }
  func.func @transform_0(%arg0: i32, %arg1: i32) -> (i32, i32) {
    %c0_i32 = arith.constant 0 : i32
    %c0_i32_0 = arith.constant 0 : i32
    return %arg0, %c0_i32 : i32, i32
  }
  func.func @transform_1(%arg0: i32, %arg1: i32) -> (i32, i32) {
    %c0_i32 = arith.constant 0 : i32
    %c0_i32_0 = arith.constant 0 : i32
    return %arg1, %c0_i32 : i32, i32
  }
  func.func @transform_2(%arg0: i32, %arg1: i32) -> (i32, i32) {
    %c0_i32 = arith.constant 0 : i32
    %c0_i32_0 = arith.constant 0 : i32
    return %arg1, %c0_i32 : i32, i32
  }
  func.func @transform_3(%arg0: i32, %arg1: i32) -> (i32, i32) {
    %c0_i32 = arith.constant 0 : i32
    %c0_i32_0 = arith.constant 0 : i32
    return %arg0, %c0_i32 : i32, i32
  }
}

</mosaic_0001>

<bundles_post_ra>
// kernel: scaled_dot_attention.1
= control target key start
LH: loop header
LB: loop body
LE: loop exit
PB: predicated region body
PF: predicated region fallthrough
CT: control target
= control target key end

     0   :  { %vm28_vm0 = vcmask 261120   ;;  %v211_v2 = vmov 0.0   ;;  %s259_s0 = inlined_call_operand.vmem [shape: f32[8,32], index: 0, kind: input, shape index: {}]   ;;  %s260_s1 = inlined_call_operand.vmem [shape: bf16[16,32], index: 1, kind: input, shape index: {}]   ;;  %s261_s2 = inlined_call_operand.vmem [shape: bf16[16,32], index: 2, kind: input, shape index: {}]   ;;  %s262_s3 = inlined_call_operand.hbm [shape: f32[8,32], index: 3, kind: output, shape index: {}]  }
   0x1   :  { %v170_v0 = vld [vmem:[%s260_s1] sm:$0xff]  ;;  %29 = vst.msk [vmem:[#allocation5] sm:$0xff] %vm28_vm0, %v211_v2 }
   0x2   :  { %v20_v1 = vld [vmem:[%s259_s0] sm:$0xff] }
   0x3   :  { %v21_v3 = vmul.f32 0.17677669, %v20_v1 }
   0x4   :  { %8 = vsyncpa [#allocation7], 0  ;;  %v43_v4 = vsel %vm28_vm0, %v170_v0, 0  ;;  %vm23_vm1 = vcmask 257024   ;;  %vm25_vm2 = vcmask 7168   ;;  %v212_v7 = vmov -inf  }
   0x5   :  { %52 = vmatpush.bf16.xpose.msra.mxu0 %v43_v4  ;;  %v22_v5 = vpack.c.bf16 %v21_v3, %v21_v3  ;;  %26 = vst.msk [vmem:[#allocation3] sm:$0xff] %vm25_vm2, %v212_v7  ;;  %vm61_vm3 = vcmask 130048   ;;  %v213_v11 = vmov 0   ;;  %v171_v18 = vld [vmem:[%s261_s2] sm:$0xff]  ;;  %s214_s2 = smov [#allocation6]   ;;  %s151_s19 = sshll.u32 %s262_s3, 4  ;;  %s152_s19 = int_to_ptr.hbm [resolvable:$true] %s151_s19 }
   0x6   :  { %27 = vst.msk [vmem:[#allocation4] sm:$0xff] %vm25_vm2, %v211_v2  ;;  %176 = vset.pattern.permute.xlu0 %v213_v11  ;;  %178 = vset.pattern.permute.xlu2 %v213_v11  ;;  %s149_s16 = sshll.u32 %s214_s2, 4  ;;  %s150_s16 = int_to_ptr.vmem [resolvable:$true] %s149_s16 }
   0x7   :  { %24 = vst.msk [vmem:[#allocation2] sm:$0xf] %vm23_vm1, %v22_v5  ;;  %177 = vset.pattern.permute.xlu1 %v213_v11  ;;  %109 = vmatpush.bf16.msra.mxu1 %v171_v18 }
   0x8   :  { %v85_v29 = vld [vmem:[#allocation5] sm:$0xff] }
   0xc   :  { %v60_v12 = vld [vmem:[#allocation3] sm:$0xff] }
   0xd   :  { %v77_v25 = vld [vmem:[#allocation4] sm:$0xff] }
   0xe   :  { %v30_v6 = vld [vmem:[#allocation2] sm:$0xf] }
   0xf   :  { %164 = vmatmul.msk.bf16.vlgmr.msra.gmra.mxu0 %vm28_vm0, %v30_v6 }
  0x8c   :  { %v54_v8 = vpop.f32.mrf.mxu0 }
  0x8d   :  { %v62_v9 = vsel %vm61_vm3, %v54_v8, -inf }
  0x8e   :  { %63 = vmax.xlane.f32.xlu0 %v62_v9 }
  0x94   :  { %v56_v10 = vpop.f32.mrf.mxu0 }
 0x101   :  { %v64_v13 = vpop.xlane.xlu0 %63 }
 0x102   :  { %v65_v14 = vmax.f32 %v60_v12, %v64_v13 }
 0x104   :  { %v66_v15 = vsub.f32 %v60_v12, %v65_v14  ;;  %117 = vst.msk [vmem:[#allocation3] sm:$0xff] %vm25_vm2, %v65_v14  ;;  %71 = vperm.xlu0 %176, %v65_v14  }
 0x106   :  { %v67_v16 = vmul.f32 1.442695, %v66_v15 }
 0x108   :  { %179 = vpow2.f32 %v67_v16 }
 0x10e   :  { %v180_v17 = vpop.eup %179 }
 0x10f   :  { %88 = vperm.xlu2 %178, %v180_v17   ;;  %v78_v26 = vmul.f32 %v180_v17, %v77_v25 }
 0x169   :  { %v89_v30 = vpop.permute.xlu2 %88 }
 0x16a   :  { %v91_v31 = vmul.f32 %v89_v30, %v85_v29 }
 0x176   :  { %v72_v19 = vpop.permute.xlu0 %71 }
 0x177   :  { %v74_v20 = vsub.f32 %v54_v8, %v72_v19 }
 0x179   :  { %v75_v21 = vmul.f32 1.442695, %v74_v20 }
 0x17b   :  { %181 = vpow2.f32 %v75_v21 }
 0x181   :  { %v182_v22 = vpop.eup %181 }
 0x182   :  { %v79_v23 = vsel %vm61_vm3, %v182_v22, 0.0  ;;  %v92_v24 = vpack.c.bf16 %v182_v22, %v182_v22 }
 0x183   :  { %80 = vadd.xlane.f32.xlu1 %v79_v23 }
 0x184   :  { %169 = vmatmul.msk.bf16.vlgmr.msra.gmra.mxu1 %vm61_vm3, %v92_v24 }
 0x1f6   :  { %v81_v27 = vpop.xlane.xlu1 %80 }
 0x1f7   :  { %v82_v28 = vadd.f32 %v81_v27, %v78_v26 }
 0x1f9   :  { %84 = vst.msk [vmem:[#allocation4] sm:$0xff] %vm25_vm2, %v82_v28 }
 0x200   :  { %v122_v32 = vld [vmem:[#allocation4] sm:$0xff] }
 0x201   :  { %v111_v33 = vpop.f32.mrf.mxu1  ;;  %125 = vperm.xlu1 %177, %v122_v32  }
 0x202   :  { %v115_v34 = vadd.f32 %v111_v33, %v91_v31 }
 0x204   :  { %116 = vst.msk [vmem:[#allocation5] sm:$0xff] %vm28_vm0, %v115_v34 }
 0x209   :  { %v113_v35 = vpop.f32.mrf.mxu1 }
 0x20b   :  { %v121_v46 = vld [vmem:[#allocation5] sm:$0xff] }
 0x273   :  { %v126_v36 = vpop.permute.xlu1 %125 }
 0x274   :  { %183 = vrcp.f32 %v126_v36  ;;  %v139_v40 = vand.u32 2147483648, %v126_v36  ;;  %v137_v42 = vand.u32 2147483647, %v126_v36  ;;  %vm133_vm5 = vweird.f32 %v126_v36 }
 0x276   :  { %v140_v44 = vor.u32 1.1754944e-38, %v139_v40  ;;  %vm138_vm7 = vcmp.eq.f32.partialorder %v137_v42, 8.507059e+37 }
 0x27a   :  { %v184_v37 = vpop.eup %183 }
 0x27b   :  { %v129_v38 = vmul.f32 %v184_v37, %v126_v36  ;;  %vm134_vm4 = vweird.f32 %v184_v37 }
 0x27c   :  { %vm135_vm6 = vmor %vm133_vm5, %vm134_vm4 }
 0x27d   :  { %v130_v39 = vsub.f32 1.0, %v129_v38 }
 0x27f   :  { %v131_v41 = vmul.f32 %v184_v37, %v130_v39 }
 0x281   :  { %v132_v43 = vadd.f32 %v184_v37, %v131_v41 }
 0x283   :  { %v136_v45 = vsel %vm135_vm6, %v184_v37, %v132_v43 }
 0x284   :  { %v141_v47 = vsel %vm138_vm7, %v140_v44, %v136_v45 }
 0x285   :  { %v142_v48 = vmul.f32 %v141_v47, %v121_v46 }
 0x287   :  { %143 = vst.msk [vmem:[#allocation6] sm:$0xff] %vm28_vm0, %v142_v48 }
 0x288   :  { %154 = dma.vmem_to_hbm [thread:$0]  %s150_s16, 128, %s152_s19, [#allocation7]  }
 0x289   :  { %209 = dma.done.wait [#allocation7], 128  }
 0x28a   :  { %210 = vsyncadd [#allocation7], 4294967168 }
 0x28b   :  { %159 = vsyncpa [#allocation7], 1 }

</bundles_post_ra>
